<compile_context>
chip_gen: v7x
topology: tpu7x:2x2x1
jax: 0.10.0
libtpu: 0.0.40
codegen_flags: <defaults>
</compile_context>

<pallas_src>
import functools

import jax
import jax.numpy as jnp
from jax import lax
from jax.experimental import pallas as pl
from jax.experimental.pallas import tpu as pltpu


def _round_up(x, m):
    return ((x + m - 1) // m) * m


def _dsh_loss_kernel(a_ref, b_ref, ya_ref, yb_ref, out_ref, acc_ref, *, m):
    j = pl.program_id(1)
    nj = pl.num_programs(1)

    # Reset the per-row-tile accumulator at the start of every j sweep.
    @pl.when(j == 0)
    def _():
        acc_ref[...] = jnp.zeros_like(acc_ref)

    # Pairwise squared distances straight off the MXU: the wrapper augmented
    # the operands so that a_i . b_j = ||u_i||^2 + ||v_j||^2 - 2 u_i.v_j.
    dist = lax.dot_general(
        a_ref[...], b_ref[...],
        dimension_numbers=(((1,), (1,)), ((), ())),
        preferred_element_type=jnp.float32)                       # (tn, tm)
    # Guard tiny negative cancellation (PyTorch's (u-v)^2 is exactly >= 0).
    dist = jnp.maximum(dist, 0.0)

    # Label similarity.  Two appended pad-flag columns make sim != 0 for any
    # pair that touches a padded row/column, so those pairs take the `dist`
    # branch below, and dist == 0 there -> zero contribution from padding.
    sim = lax.dot_general(
        ya_ref[...], yb_ref[...],
        dimension_numbers=(((1,), (1,)), ((), ())),
        preferred_element_type=jnp.float32)                       # (tn, tm)

    # (1-ymask)/2 * dist + ymask/2 * max(m - dist, 0), with the 1/2 folded
    # into the final normalization outside the kernel.
    loss_tile = jnp.where(sim == 0.0, jnp.maximum(m - dist, 0.0), dist)

    # Row-wise reduction to (tn, 1); only a tiny accumulator stays resident
    # (no full-tile read-modify-write per grid step).
    acc_ref[...] += jnp.sum(loss_tile, axis=1, keepdims=True)

    # One scalar per row tile, emitted lane-dense (same value in all lanes).
    @pl.when(j == nj - 1)
    def _():
        out_ref[...] = jnp.zeros((1, 1, 128), jnp.float32) + jnp.sum(acc_ref[...])


def dsh_loss(u, y, feat2=None, *, bit, tn=512, tm=1024):
    """Pallas implementation of DSHLoss(bit).forward(u, y, feat2)."""
    f2 = u if feat2 is None else feat2
    n, d = u.shape
    n2 = f2.shape[0]
    c = y.shape[1]
    # The PyTorch module adds an (N, N) label mask to an (N, M) distance
    # matrix, so it only makes sense when M == N.
    assert n2 == n, "feat2 must have the same number of rows as u"

    # --- tile sizes -------------------------------------------------------
    # i side multiple of 16 (bf16 label sublane packing), j side multiple of
    # 128 (lane-dense loss tiles).
    tn = _round_up(max(16, min(tn, _round_up(n, 16))), 16)
    tm = _round_up(max(128, min(tm, _round_up(n2, 128))), 128)
    # Prefer >= 2 row tiles so the "parallel" i axis can shard across the two
    # TensorCores of a v7x megacore (harmless on single-TC v5e / v6e).
    if n >= 32 and _round_up(n, tn) == tn:
        tn = _round_up((n + 1) // 2, 16)
    n_pad = _round_up(n, tn)
    n2_pad = _round_up(n2, tm)
    gi = n_pad // tn
    gj = n2_pad // tm

    # --- operand augmentation (all norm math hoisted out of the kernel) ----
    u32 = u.astype(jnp.float32)
    v32 = f2.astype(jnp.float32)
    usq = jnp.sum(u32 * u32, axis=1, keepdims=True)               # (n, 1)
    vsq = jnp.sum(v32 * v32, axis=1, keepdims=True)               # (n2, 1)
    a = jnp.concatenate([-2.0 * u32, usq, jnp.ones((n, 1), jnp.float32)], axis=1)
    b = jnp.concatenate([v32, jnp.ones((n2, 1), jnp.float32), vsq], axis=1)
    a = jnp.pad(a, ((0, n_pad - n), (0, 0)))      # padded rows all-zero -> dist == 0
    b = jnp.pad(b, ((0, n2_pad - n2), (0, 0)))
    dk = d + 2

    # Labels as bf16 (assumed exactly representable, e.g. 0/1 multi-hot) plus
    # two pad-flag columns: sim_extra[i,j] = [i padded] + [j padded].
    y_bf = y.astype(jnp.bfloat16)
    i_pad_flag = (jnp.arange(n_pad) >= n).astype(jnp.bfloat16)[:, None]
    j_pad_flag = (jnp.arange(n2_pad) >= n2).astype(jnp.bfloat16)[:, None]
    ya = jnp.concatenate([jnp.pad(y_bf, ((0, n_pad - n), (0, 0))),
                          i_pad_flag,
                          jnp.ones((n_pad, 1), jnp.bfloat16)], axis=1)
    yb = jnp.concatenate([jnp.pad(y_bf, ((0, n2_pad - n2), (0, 0))),
                          jnp.ones((n2_pad, 1), jnp.bfloat16),
                          j_pad_flag], axis=1)
    ck = c + 2

    kernel = functools.partial(_dsh_loss_kernel, m=float(2 * bit))

    flops = int(2 * n_pad * n2_pad * (dk + ck) + 6 * n_pad * n2_pad)
    bytes_accessed = int(
        n_pad * (dk * 4 + ck * 2)                   # i-side streamed once
        + gi * n2_pad * (dk * 4 + ck * 2)           # j-side per row-tile sweep
        + gi * 128 * 4)                             # partial-sum output

    partials = pl.pallas_call(
        kernel,
        out_shape=jax.ShapeDtypeStruct((gi, 1, 128), jnp.float32),
        grid_spec=pltpu.PrefetchScalarGridSpec(
            num_scalar_prefetch=0,
            grid=(gi, gj),
            in_specs=[
                pl.BlockSpec((tn, dk), lambda i, j: (i, 0)),   # [-2u | usq | 1]
                pl.BlockSpec((tm, dk), lambda i, j: (j, 0)),   # [v | 1 | vsq]
                pl.BlockSpec((tn, ck), lambda i, j: (i, 0)),   # labels (i side)
                pl.BlockSpec((tm, ck), lambda i, j: (j, 0)),   # labels (j side)
            ],
            out_specs=pl.BlockSpec((1, 1, 128), lambda i, j: (i, 0, 0)),
            scratch_shapes=[pltpu.VMEM((tn, 1), jnp.float32)],
        ),
        compiler_params=pltpu.CompilerParams(
            dimension_semantics=("parallel", "arbitrary"),
            vmem_limit_bytes=32 * 1024 * 1024),
        cost_estimate=pl.CostEstimate(
            flops=flops, transcendentals=0, bytes_accessed=bytes_accessed),
    )(a, b, ya, yb)

    # All 128 lanes of each row-tile partial hold the same value; the 0.5 of
    # the loss formula is folded in here.
    return jnp.sum(partials[:, 0, 0]) * (0.5 / float(n * n2))


def _dsh_loss_ref(u, y, feat2, bit):
    """Pure-JAX reference mirroring the PyTorch forward exactly."""
    f2 = u if feat2 is None else feat2
    dist = jnp.sum((u[:, None, :] - f2[None, :, :]) ** 2, axis=2)
    ymask = ((y @ y.T) == 0).astype(jnp.float32)
    m = 2.0 * bit
    loss = (1.0 - ymask) / 2.0 * dist + ymask / 2.0 * jnp.maximum(m - dist, 0.0)
    return loss.mean()


if __name__ == "__main__":
    key = jax.random.PRNGKey(0)
    k1, k2, k3, k4, k5 = jax.random.split(key, 5)

    # Small shapes consistent with the module: batch N, hash length `bit`,
    # C label classes (multi-hot 0/1).
    N, BIT, C = 16, 8, 4
    u = jax.random.normal(k1, (N, BIT), dtype=jnp.float32)
    y = (jax.random.uniform(k2, (N, C)) < 0.5).astype(jnp.float32)
    feat2 = jax.random.normal(k3, (N, BIT), dtype=jnp.float32)

    # Path 1: feat2 is None (self pairwise distances).
    loss_self = dsh_loss(u, y, bit=BIT)
    # Path 2: explicit feat2.
    loss_cross = dsh_loss(u, y, feat2, bit=BIT)

    # Path 3: non-tile-aligned batch, default tiles (exercises the gi>=2 split
    # plus row/column padding handled via the pad-flag label columns).
    N2 = 200
    u2 = jax.random.normal(k4, (N2, BIT), dtype=jnp.float32)
    y2 = (jax.random.uniform(k5, (N2, C)) < 0.5).astype(jnp.float32)
    loss_big = dsh_loss(u2, y2, bit=BIT)
    # Path 4: small forced tiles to exercise a real multi-tile (13 x 2) grid
    # with per-row-tile accumulation and padding on both axes.
    loss_small_tiles = dsh_loss(u2, y2, bit=BIT, tn=16, tm=128)

    jax.block_until_ready((loss_self, loss_cross, loss_big, loss_small_tiles))

    ref_self = _dsh_loss_ref(u, y, None, BIT)
    ref_cross = _dsh_loss_ref(u, y, feat2, BIT)
    ref_big = _dsh_loss_ref(u2, y2, None, BIT)

    assert jnp.allclose(loss_self, ref_self, rtol=1e-4, atol=1e-4), \
        (loss_self, ref_self)
    assert jnp.allclose(loss_cross, ref_cross, rtol=1e-4, atol=1e-4), \
        (loss_cross, ref_cross)
    assert jnp.allclose(loss_big, ref_big, rtol=1e-4, atol=1e-4), \
        (loss_big, ref_big)
    assert jnp.allclose(loss_small_tiles, ref_big, rtol=1e-4, atol=1e-4), \
        (loss_small_tiles, ref_big)

    print("KERNEL_OK")
</pallas_src>

<mosaic_0001>
module attributes {stable_mosaic.version = 11 : i64} {
  func.func @_dsh_loss_kernel(%arg0: i32, %arg1: i32, %arg2: memref<16x10xf32, #tpu.memory_space<vmem>>, %arg3: memref<128x10xf32, #tpu.memory_space<vmem>>, %arg4: memref<16x6xbf16, #tpu.memory_space<vmem>>, %arg5: memref<128x6xbf16, #tpu.memory_space<vmem>>, %arg6: memref<1x1x128xf32, #tpu.memory_space<vmem>>, %arg7: memref<16x1xf32, #tpu.memory_space<vmem>>) attributes {dimension_semantics = [#tpu.dimension_semantics<parallel>, #tpu.dimension_semantics<arbitrary>], iteration_bounds = array<i64: 1, 1>, scalar_prefetch = 0 : i64, scratch_operands = 1 : i64, tpu.core_type = #tpu.core_type<tc>, window_params = [{transform_indices = @transform_0, window_bounds = array<i64: 16, 10>}, {transform_indices = @transform_1, window_bounds = array<i64: 128, 10>}, {transform_indices = @transform_2, window_bounds = array<i64: 16, 6>}, {transform_indices = @transform_3, window_bounds = array<i64: 128, 6>}, {transform_indices = @transform_4, window_bounds = array<i64: 1, 1, 128>}]} {
    %c0_i32 = arith.constant 0 : i32
    %0 = arith.cmpi eq, %arg1, %c0_i32 : i32
    %1 = arith.extui %0 : i1 to i32
    %c0_i32_0 = arith.constant 0 : i32
    %2 = arith.cmpi ne, %1, %c0_i32_0 : i32
    scf.if %2 {
      %cst_20 = arith.constant 0.000000e+00 : f32
      %26 = vector.broadcast %cst_20 : f32 to vector<16x1xf32>
      %c0_21 = arith.constant 0 : index
      %c0_22 = arith.constant 0 : index
      %27 = vector.load %arg7[%c0_21, %c0_22] : memref<16x1xf32, #tpu.memory_space<vmem>>, vector<16x1xf32>
      tpu.vector_store %arg7[%c0_21, %c0_22], %26 {strides = array<i32>} : memref<16x1xf32, #tpu.memory_space<vmem>>, vector<16x1xf32>,
    } else {
    }
    %c0 = arith.constant 0 : index
    %c0_1 = arith.constant 0 : index
    %3 = vector.load %arg2[%c0, %c0_1] : memref<16x10xf32, #tpu.memory_space<vmem>>, vector<16x10xf32>
    %c0_2 = arith.constant 0 : index
    %c0_3 = arith.constant 0 : index
    %4 = vector.load %arg3[%c0_2, %c0_3] : memref<128x10xf32, #tpu.memory_space<vmem>>, vector<128x10xf32>
    %cst = arith.constant dense<0.000000e+00> : vector<16x128xf32>
    %5 = tpu.matmul %3, %4, %cst {dimension_numbers = #tpu.dot_dimension_numbers<[1], [1], [0], [0], [0, 0, 1, 0], [], []>} : vector<16x10xf32>, vector<128x10xf32>, vector<16x128xf32> -> vector<16x128xf32>
    %cst_4 = arith.constant 0.000000e+00 : f32
    %6 = vector.broadcast %cst_4 : f32 to vector<16x128xf32>
    %7 = arith.maximumf %5, %6 : vector<16x128xf32>
    %c0_5 = arith.constant 0 : index
    %c0_6 = arith.constant 0 : index
    %8 = vector.load %arg4[%c0_5, %c0_6] : memref<16x6xbf16, #tpu.memory_space<vmem>>, vector<16x6xbf16>
    %c0_7 = arith.constant 0 : index
    %c0_8 = arith.constant 0 : index
    %9 = vector.load %arg5[%c0_7, %c0_8] : memref<128x6xbf16, #tpu.memory_space<vmem>>, vector<128x6xbf16>
    %cst_9 = arith.constant dense<0.000000e+00> : vector<16x128xf32>
    %10 = tpu.matmul %8, %9, %cst_9 {dimension_numbers = #tpu.dot_dimension_numbers<[1], [1], [0], [0], [0, 0, 1, 0], [], []>} : vector<16x6xbf16>, vector<128x6xbf16>, vector<16x128xf32> -> vector<16x128xf32>
    %cst_10 = arith.constant 0.000000e+00 : f32
    %11 = vector.broadcast %cst_10 : f32 to vector<16x128xf32>
    %12 = arith.cmpf oeq, %10, %11 : vector<16x128xf32>
    %cst_11 = arith.constant 1.600000e+01 : f32
    %13 = vector.broadcast %cst_11 : f32 to vector<16x128xf32>
    %14 = arith.subf %13, %7 : vector<16x128xf32>
    %cst_12 = arith.constant 0.000000e+00 : f32
    %15 = vector.broadcast %cst_12 : f32 to vector<16x128xf32>
    %16 = arith.maximumf %14, %15 : vector<16x128xf32>
    %17 = arith.select %12, %16, %7 : vector<16x128xi1>, vector<16x128xf32>
    %c0_13 = arith.constant 0 : index
    %c0_14 = arith.constant 0 : index
    %18 = vector.load %arg7[%c0_13, %c0_14] : memref<16x1xf32, #tpu.memory_space<vmem>>, vector<16x1xf32>
    %cst_15 = arith.constant dense<0.000000e+00> : vector<16xf32>
    %19 = vector.multi_reduction <add>, %17, %cst_15 [1] : vector<16x128xf32> to vector<16xf32>
    %20 = vector.shape_cast %19 : vector<16xf32> to vector<16x1xf32>
    %21 = arith.addf %18, %20 : vector<16x1xf32>
    %c0_16 = arith.constant 0 : index
    %c0_17 = arith.constant 0 : index
    %22 = vector.load %arg7[%c0_16, %c0_17] : memref<16x1xf32, #tpu.memory_space<vmem>>, vector<16x1xf32>
    tpu.vector_store %arg7[%c0_16, %c0_17], %21 {strides = array<i32>} : memref<16x1xf32, #tpu.memory_space<vmem>>, vector<16x1xf32>,
    %c0_i32_18 = arith.constant 0 : i32
    %23 = arith.cmpi eq, %arg1, %c0_i32_18 : i32
    %24 = arith.extui %23 : i1 to i32
    %c0_i32_19 = arith.constant 0 : i32
    %25 = arith.cmpi ne, %24, %c0_i32_19 : i32
    scf.if %25 {
      %cst_20 = arith.constant 0.000000e+00 : f32
      %26 = vector.broadcast %cst_20 : f32 to vector<1x1x128xf32>
      %c0_21 = arith.constant 0 : index
      %c0_22 = arith.constant 0 : index
      %27 = vector.load %arg7[%c0_21, %c0_22] : memref<16x1xf32, #tpu.memory_space<vmem>>, vector<16x1xf32>
      %28 = vector.shape_cast %27 : vector<16x1xf32> to vector<1x16x1xf32>
      %cst_23 = arith.constant dense<0.000000e+00> : vector<1xf32>
      %29 = vector.multi_reduction <add>, %28, %cst_23 [1, 2] : vector<1x16x1xf32> to vector<1xf32>
      %30 = vector.shape_cast %29 : vector<1xf32> to vector<1x1x1xf32>
      %31 = vector.extract %30[0, 0, 0] : f32 from vector<1x1x1xf32>
      %32 = vector.broadcast %31 : f32 to vector<1x1x128xf32>
      %33 = arith.addf %26, %32 : vector<1x1x128xf32>
      %c0_24 = arith.constant 0 : index
      %c0_25 = arith.constant 0 : index
      %c0_26 = arith.constant 0 : index
      %34 = vector.load %arg6[%c0_24, %c0_25, %c0_26] : memref<1x1x128xf32, #tpu.memory_space<vmem>>, vector<1x1x128xf32>
      tpu.vector_store %arg6[%c0_24, %c0_25, %c0_26], %33 {strides = array<i32>} : memref<1x1x128xf32, #tpu.memory_space<vmem>>, vector<1x1x128xf32>,
    } else {
    }
    return
  }
  func.func @transform_0(%arg0: i32, %arg1: i32) -> (i32, i32) {
    %c0_i32 = arith.constant 0 : i32
    %c0_i32_0 = arith.constant 0 : i32
    return %arg0, %c0_i32 : i32, i32
  }
  func.func @transform_1(%arg0: i32, %arg1: i32) -> (i32, i32) {
    %c0_i32 = arith.constant 0 : i32
    %c0_i32_0 = arith.constant 0 : i32
    return %arg1, %c0_i32 : i32, i32
  }
  func.func @transform_2(%arg0: i32, %arg1: i32) -> (i32, i32) {
    %c0_i32 = arith.constant 0 : i32
    %c0_i32_0 = arith.constant 0 : i32
    return %arg0, %c0_i32 : i32, i32
  }
  func.func @transform_3(%arg0: i32, %arg1: i32) -> (i32, i32) {
    %c0_i32 = arith.constant 0 : i32
    %c0_i32_0 = arith.constant 0 : i32
    return %arg1, %c0_i32 : i32, i32
  }
  func.func @transform_4(%arg0: i32, %arg1: i32) -> (i32, i32, i32) {
    %c0_i32 = arith.constant 0 : i32
    %c0_i32_0 = arith.constant 0 : i32
    %c0_i32_1 = arith.constant 0 : i32
    return %arg0, %c0_i32, %c0_i32_0 : i32, i32, i32
  }
}

</mosaic_0001>

<bundles_post_ra>
// kernel: tpu_custom_call.1
= control target key start
LH: loop header
LB: loop body
LE: loop exit
PB: predicated region body
PF: predicated region fallthrough
CT: control target
= control target key end

     0   :  { %vm44_vm0 = vcmask 80896   ;;  %v557_v4 = vmov 0.0   ;;  %vm239_vm2 = vcmask 48128   ;;  %vm558_vm3 = vmmov 0   ;;  %s738_s0 = inlined_call_operand.vmem [shape: f32[16,10], index: 0, kind: input, shape index: {}]   ;;  %s739_s1 = inlined_call_operand.vmem [shape: f32[128,10], index: 1, kind: input, shape index: {}]   ;;  %s740_s2 = inlined_call_operand.vmem [shape: bf16[16,6], index: 2, kind: input, shape index: {}]   ;;  %s741_s3 = inlined_call_operand.vmem [shape: bf16[128,6], index: 3, kind: input, shape index: {}]   ;;  %s742_s4 = inlined_call_operand.hbm [shape: f32[1,1,128], index: 4, kind: output, shape index: {}]  }
   0x1   :  { %v28_v0 = vld [vmem:[%s739_s1] sm:$0xff]  ;;  %v29_v1 = vld [vmem:[%s739_s1 + $0x8] sm:$0xff]  ;;  %vm593_vm1 = vmpackc.low %vm44_vm0, %vm44_vm0  ;;  %451 = vmatprep.subr.bf16.mxu1 %v557_v4  ;;  %467 = vmatprep.mubr.msk.bf16.mxu1 %vm558_vm3, %v557_v4 }
   0x2   :  { %v471_v2 = vpack.c.bf16 %v29_v1, %v28_v0  ;;  %v524_v5 = vld [vmem:[%s741_s3] sm:$0xff]   ;;  %v30_v6 = vld [vmem:[%s739_s1 + $0x10] sm:$0xff]  ;;  %v31_v7 = vld [vmem:[%s739_s1 + $0x18] sm:$0xff] }
   0x3   :  { %v244_v8 = vsel %vm239_vm2, %v524_v5, 0  ;;  %v477_v9 = vpack.c.bf16 %v31_v7, %v30_v6  ;;  %v525_v10 = vld [vmem:[%s741_s3 + $0x8] sm:$0xff]   ;;  %v32_v11 = vld [vmem:[%s739_s1 + $0x20] sm:$0xff]  ;;  %v526_v15 = vld [vmem:[%s741_s3 + $0x10] sm:$0xff]  }
   0x4   :  { %473 = vmatprep.subr.msk.bf16.mxu0 %vm593_vm1, %v471_v2  ;;  %452 = vmatpush3.bf16.xpose.msra.mxu1 %v244_v8  ;;  %v33_v12 = vld [vmem:[%s739_s1 + $0x28] sm:$0xff]  ;;  %v247_v13 = vsel %vm239_vm2, %v525_v10, 0  ;;  %v34_v16 = vld [vmem:[%s739_s1 + $0x30] sm:$0xff]  ;;  %v26_v17 = vld [vmem:[%s738_s0] sm:$0xff] }
   0x5   :  { %476 = vmatpush3.bf16.xpose.msk.msra.mxu0 %vm593_vm1, %v471_v2  ;;  %453 = vmatprep.subr.bf16.mxu1 %v557_v4  ;;  %v483_v14 = vpack.c.bf16 %v33_v12, %v32_v11  ;;  %v35_v18 = vld [vmem:[%s739_s1 + $0x38] sm:$0xff] }
   0x6   :  { %479 = vmatprep.subr.msk.bf16.mxu0 %vm593_vm1, %v477_v9  ;;  %448 = vmatprep.mubr.msk.f32.mxu0 %vm44_vm0, %v26_v17 }
   0xc   :  { %454 = vmatpush3.bf16.xpose.msra.mxu1 %v247_v13 }
   0xd   :  { %482 = vmatpush3.bf16.xpose.msk.msra.mxu0 %vm593_vm1, %v477_v9  ;;  %455 = vmatprep.subr.bf16.mxu1 %v557_v4 }
   0xe   :  { %485 = vmatprep.subr.msk.bf16.mxu0 %vm593_vm1, %v483_v14 }
   0xf   :  { %9 = vsyncpa [#allocation4], 0  ;;  %v250_v19 = vsel %vm239_vm2, %v526_v15, 0  ;;  %v489_v20 = vpack.c.bf16 %v35_v18, %v34_v16  ;;  %v527_v21 = vld [vmem:[%s741_s3 + $0x18] sm:$0xff]   ;;  %v36_v22 = vld [vmem:[%s739_s1 + $0x40] sm:$0xff]  ;;  %vm23_vm6 = vcmask 7168  }
  0x10   :  { %v37_v23 = vld [vmem:[%s739_s1 + $0x48] sm:$0xff]  ;;  %v253_v24 = vsel %vm239_vm2, %v527_v21, 0  ;;  %v528_v26 = vld [vmem:[%s741_s3 + $0x20] sm:$0xff]   ;;  %v38_v27 = vld [vmem:[%s739_s1 + $0x50] sm:$0xff]  ;;  %24 = vst.msk [vmem:[#allocation2] sm:$0xff] %vm23_vm6, %v557_v4 }
  0x11   :  { %v495_v25 = vpack.c.bf16 %v37_v23, %v36_v22  ;;  %v39_v28 = vld [vmem:[%s739_s1 + $0x58] sm:$0xff]  ;;  %v256_v29 = vsel %vm239_vm2, %v528_v26, 0  ;;  %v529_v31 = vld [vmem:[%s741_s3 + $0x28] sm:$0xff]   ;;  %v40_v32 = vld [vmem:[%s739_s1 + $0x60] sm:$0xff]  ;;  %25 = vst.msk [vmem:[#allocation2 + $0x8] sm:$0xff] %vm23_vm6, %v557_v4 }
  0x12   :  { %v501_v30 = vpack.c.bf16 %v39_v28, %v38_v27  ;;  %v41_v33 = vld [vmem:[%s739_s1 + $0x68] sm:$0xff]  ;;  %v259_v34 = vsel %vm239_vm2, %v529_v31, 0  ;;  %v530_v36 = vld [vmem:[%s741_s3 + $0x30] sm:$0xff]   ;;  %v43_v38 = vld [vmem:[%s739_s1 + $0x78] sm:$0xff] }
  0x13   :  { %v507_v35 = vpack.c.bf16 %v41_v33, %v40_v32  ;;  %v42_v37 = vld [vmem:[%s739_s1 + $0x70] sm:$0xff]  ;;  %v262_v39 = vsel %vm239_vm2, %v530_v36, 0  ;;  %v531_v41 = vld [vmem:[%s741_s3 + $0x38] sm:$0xff]   ;;  %v532_v43 = vld [vmem:[%s740_s2] sm:$0xff]  }
  0x14   :  { %456 = vmatpush3.bf16.xpose.msra.mxu1 %v250_v19  ;;  %v513_v40 = vpack.c.bf16 %v43_v38, %v42_v37  ;;  %v265_v42 = vsel %vm239_vm2, %v531_v41, 0  ;;  %v27_v44 = vld [vmem:[%s738_s0 + $0x8] sm:$0xff]  ;;  %s559_s0 = smov [#allocation3]  }
  0x15   :  { %488 = vmatpush3.bf16.xpose.msk.msra.mxu0 %vm593_vm1, %v483_v14  ;;  %457 = vmatprep.subr.bf16.mxu1 %v557_v4  ;;  %s353_s2 = sshll.u32 %s559_s0, 4  ;;  %s354_s2 = int_to_ptr.vmem [resolvable:$true] %s353_s2 }
  0x16   :  { %491 = vmatprep.subr.msk.bf16.mxu0 %vm593_vm1, %v489_v20  ;;  %s533_s16 = scalar_lea.vmem %s354_s2, 16  ;;  %s537_s17 = scalar_lea.vmem %s354_s2, 32 }
  0x17   :  { %v316_v59 = vld [vmem:[#allocation2] sm:$0xff]  ;;  %p534_p0 = scmp.ne.s32.totalorder %s354_s2, %s533_s16  ;;  %p538_p1 = scmp.lt.s32.totalorder %s354_s2, %s354_s2 }
  0x18   :  { %v317_v62 = vld [vmem:[#allocation2 + $0x8] sm:$0xff]  ;;  %p539_p2 = scmp.lt.s32.totalorder %s537_s17, %s533_s16 }
  0x1a   :  { %p540_p3 = por %p539_p2, %p538_p1 }
  0x1c   :  { %458 = vmatpush3.bf16.xpose.msra.mxu1 %v253_v24  ;;  %p541_p4 = pnand %p540_p3, %p534_p0 }
  0x1d   :  { %494 = vmatpush3.bf16.xpose.msk.msra.mxu0 %vm593_vm1, %v489_v20  ;;  %459 = vmatprep.subr.bf16.mxu1 %v557_v4 }
  0x1e   :  { %497 = vmatprep.subr.msk.bf16.mxu0 %vm593_vm1, %v495_v25 }
  0x24   :  { %460 = vmatpush3.bf16.xpose.msra.mxu1 %v256_v29 }
  0x25   :  { %500 = vmatpush3.bf16.xpose.msk.msra.mxu0 %vm593_vm1, %v495_v25  ;;  %461 = vmatprep.subr.bf16.mxu1 %v557_v4 }
  0x26   :  { %503 = vmatprep.subr.msk.bf16.mxu0 %vm593_vm1, %v501_v30 }
  0x2c   :  { %462 = vmatpush3.bf16.xpose.msra.mxu1 %v259_v34 }
  0x2d   :  { %506 = vmatpush3.bf16.xpose.msk.msra.mxu0 %vm593_vm1, %v501_v30  ;;  %463 = vmatprep.subr.bf16.mxu1 %v557_v4 }
  0x2e   :  { %509 = vmatprep.subr.msk.bf16.mxu0 %vm593_vm1, %v507_v35 }
  0x34   :  { %464 = vmatpush3.bf16.xpose.msra.mxu1 %v262_v39 }
  0x35   :  { %512 = vmatpush3.bf16.xpose.msk.msra.mxu0 %vm593_vm1, %v507_v35  ;;  %465 = vmatprep.subr.bf16.mxu1 %v557_v4 }
  0x36   :  { %515 = vmatprep.subr.msk.bf16.mxu0 %vm593_vm1, %v513_v40 }
  0x3c   :  { %466 = vmatpush3.bf16.xpose.msra.mxu1 %v265_v42 }
  0x3d   :  { %518 = vmatpush3.bf16.xpose.msk.msra.mxu0 %vm593_vm1, %v513_v40 }
  0x43   :  { %468 = vmatmul.mubr.msk.bf16.vlgmr.msra.gmra.mrb[0].mxu1 %vm239_vm2, %v532_v43 }
  0x44   :  { %449 = vmatmul.mubr.msk.f32.vlgmr.msra.gmra.mrb[0].mxu0 %vm44_vm0, %v27_v44 }
 0x116   :  { %v301_v46 = vpop.f32.mrb[0].mxu1 }
 0x117   :  { %v450_v45 = vpop.f32.mrb[0].mxu0  ;;  %v469_v49 = vpop.f32.mrb[1].mxu1  ;;  %vm308_vm5 = vcmp.eq.f32.partialorder %v301_v46, 0.0 }
 0x118   :  { %v175_v47 = vmax.f32 %v450_v45, 0.0  ;;  %v165_v48 = vpop.f32.mrb[1].mxu0  ;;  %v304_v51 = vpop.f32.mrb[2].mxu1 }
 0x119   :  { %v174_v50 = vmax.f32 %v165_v48, 0.0  ;;  %v470_v53 = vpop.f32.mrb[3].mxu1  ;;  %vm309_vm4 = vcmp.eq.f32.partialorder %v304_v51, 0.0 }
 0x11a   :  { %v311_v52 = vsub.f32 16.0, %v175_v47 }
 0x11b   :  { %v310_v54 = vsub.f32 16.0, %v174_v50 }
 0x11c   :  { %v313_v55 = vmax.f32 %v311_v52, 0.0 }
 0x11d   :  { %v312_v56 = vmax.f32 %v310_v54, 0.0 }
 0x11e   :  { %v315_v57 = vsel %vm309_vm4, %v313_v55, %v175_v47 }
 0x11f   :  { %v314_v58 = vsel %vm308_vm5, %v312_v56, %v174_v50 }
 0x120   :  { %318 = vadd.xlane.f32.xlu0 %v314_v58 }
 0x124   :  { %320 = vadd.xlane.f32.xlu0 %v315_v57 }
 0x1ad   :  { %v319_v60 = vpop.xlane.xlu0 %318 }
 0x1ae   :  { %v322_v61 = vadd.f32 %v319_v60, %v316_v59 }
 0x1b0   :  { %325 = vst.msk [vmem:[#allocation2] sm:$0xff] %vm23_vm6, %v322_v61 }
 0x1b1   :  { %v321_v63 = vpop.xlane.xlu0 %320 }
 0x1b2   :  { %v323_v0 = vadd.f32 %v321_v63, %v317_v62 }
 0x1b4   :  { %326 = vst.msk [vmem:[#allocation2 + $0x8] sm:$0xff] %vm23_vm6, %v323_v0 }
 0x1b7   :  { %v330_v1 = vld [vmem:[#allocation2] sm:$0xff] }
 0x1b8   :  { %v332_v3 = vsel %vm23_vm6, %v330_v1, 0.0 }
 0x1bb   :  { %v331_v2 = vld [vmem:[#allocation2 + $0x8] sm:$0xff] }
 0x1bc   :  { %v333_v5 = vsel %vm23_vm6, %v331_v2, 0.0 }
 0x1bd   :  { %v334_v6 = vadd.f32 %v333_v5, %v332_v3 }
 0x1bf   :  { %335 = vadd.xlane.f32.xlu1 %v334_v6 }
 0x24c   :  { %v336_v7 = vpop.xlane.xlu1 %335 }
 0x24d   :  { %v337_v8 = vrot.slane %v336_v7, 4 }
 0x24f   :  { %v338_v9 = vadd.f32 %v337_v8, %v336_v7 }
 0x251   :  { %v339_v10 = vrot.slane %v338_v9, 2 }
 0x253   :  { %v340_v11 = vadd.f32 %v339_v10, %v338_v9 }
 0x255   :  { %v341_v4 = vrot.slane %v340_v11, 1 }
 0x257   :  { %v342_v12 = vadd.f32 %v341_v4, %v340_v11 }
 0x259   :  { %519 = vpush %v342_v12 }
 0x28a   :  { %s520_s3 = spop %519 }
 0x28b   :  { %v344_v13 = vstv %s520_s3 }
 0x28c   :  { %346 = vst [vmem:[#allocation3] sm:$0x1] %v344_v13 }
 0x28d   :  { %544 = shalt.err (!%p541_p4)
}
 0x28e   :  { %s545_s20 = scalar_lea.hbm %s742_s4, 16 }
 0x28f   :  { %p546_p5 = scmp.ne.s32.totalorder %s742_s4, %s545_s20  ;;  %p549_p6 = scmp.lt.u32.totalorder %s545_s20, %s742_s4 }
 0x291   :  { %p551_p7 = pnand %p549_p6, %p546_p5 }
 0x293   :  { %554 = shalt.err (!%p551_p7)
}
 0x294   :  { %356 = dma.vmem_to_hbm [thread:$0]  %s354_s2, 16, %s742_s4, [#allocation4]  }
 0x295   :  { %555 = dma.done.wait [#allocation4], 16  }
 0x296   :  { %556 = vsyncadd [#allocation4], 4294967280 }
 0x297   :  { %360 = vsyncpa [#allocation4], 1 }

</bundles_post_ra>
